<compile_context>
chip_gen: v6e
topology: v6e:2x2x1
jax: 0.10.0
libtpu: 0.0.40
codegen_flags: <defaults>
</compile_context>

<pallas_src>
import functools

import jax
import jax.numpy as jnp
from jax.experimental import pallas as pl
from jax.experimental.pallas import tpu as pltpu


def _round_up(x, m):
    return ((x + m - 1) // m) * m


# --------------------- Kernel 1: patch-embedding matmul --------------------- #
def _matmul_bias_kernel(x_ref, w_ref, b_ref, o_ref):
    acc = jnp.dot(x_ref[...], w_ref[...], preferred_element_type=jnp.float32)
    o_ref[...] = (acc + b_ref[...]).astype(o_ref.dtype)


def matmul_bias(x, w, b, *, tm=256):
    """out = x @ w + b, rows tiled over a 1-D grid with a large M tile."""
    M, K = x.shape
    K2, N = w.shape
    assert K == K2 and N % 128 == 0 and K % 128 == 0
    tm_eff = min(tm, _round_up(M, 8))         # big tile, clipped to problem size
    m_pad = _round_up(M, tm_eff)
    if m_pad != M:
        x = jnp.pad(x, ((0, m_pad - M), (0, 0)))

    cost = pl.CostEstimate(
        flops=2 * m_pad * K * N,
        transcendentals=0,
        bytes_accessed=4 * (m_pad * K + K * N + m_pad * N))

    out = pl.pallas_call(
        _matmul_bias_kernel,
        out_shape=jax.ShapeDtypeStruct((m_pad, N), jnp.float32),
        grid_spec=pltpu.PrefetchScalarGridSpec(
            num_scalar_prefetch=0,
            grid=(m_pad // tm_eff,),
            in_specs=[
                pl.BlockSpec((tm_eff, K), lambda i: (i, 0)),   # patch rows (tiled)
                pl.BlockSpec((K, N), lambda i: (0, 0)),        # weight (resident)
                pl.BlockSpec((1, N), lambda i: (0, 0)),        # folded bias
            ],
            out_specs=pl.BlockSpec((tm_eff, N), lambda i: (i, 0)),
        ),
        compiler_params=pltpu.CompilerParams(dimension_semantics=("parallel",)),
        cost_estimate=cost,
    )(x, w, b.reshape(1, N))
    return out[:M]


# ------------- Kernel 2: fused 3x3 conv + folded BatchNorm + ReLU ----------- #
def _conv3x3_bias_relu_kernel(x_ref, w_ref, b_ref, o_ref, *, Wp, Lout):
    # x_ref: (1, Hp*Wp, Ep) flattened, spatially zero-padded feature map (one batch)
    # w_ref: (9, Ep, Ep)    conv taps with BN scale folded in
    # b_ref: (1, Ep)        conv bias with BN shift folded in
    # o_ref: (1, Lout, Ep)  flattened output (columns >= Wo per row are junk, sliced
    #                       off on the host)
    Ep = o_ref.shape[-1]
    acc = jnp.zeros((Lout, Ep), jnp.float32)
    for di in range(3):
        for dj in range(3):
            off = di * Wp + dj                       # static offset per tap
            tap = x_ref[0, off:off + Lout, :]        # contiguous 2-D slice in VMEM
            acc = acc + jnp.dot(tap, w_ref[di * 3 + dj],
                                preferred_element_type=jnp.float32)
    acc = jnp.maximum(acc + b_ref[...], 0.0)
    o_ref[0] = acc.astype(o_ref.dtype)


def conv3x3_bias_relu(x_nhwc, w_taps, b):
    """relu(conv3x3(x, pad=1, stride=1) + b) with taps computed in-kernel (no im2col)."""
    B, Ho, Wo, Ep = x_nhwc.shape
    assert Ep % 128 == 0 and w_taps.shape == (9, Ep, Ep)
    Wp = Wo + 2
    # 1 row pad on top, 2 on bottom (the extra row gives slack for the strided-slice
    # trick), 1 column left/right; flatten (H, W) so every tap is a contiguous slice.
    xp = jnp.pad(x_nhwc, ((0, 0), (1, 2), (1, 1), (0, 0)))
    xflat = xp.reshape(B, (Ho + 3) * Wp, Ep)
    Lout = Ho * Wp

    cost = pl.CostEstimate(
        flops=2 * B * Lout * 9 * Ep * Ep,
        transcendentals=0,
        bytes_accessed=4 * (xflat.size + w_taps.size + B * Lout * Ep))

    kernel = functools.partial(_conv3x3_bias_relu_kernel, Wp=Wp, Lout=Lout)
    out = pl.pallas_call(
        kernel,
        out_shape=jax.ShapeDtypeStruct((B, Lout, Ep), jnp.float32),
        grid_spec=pltpu.PrefetchScalarGridSpec(
            num_scalar_prefetch=0,
            grid=(B,),
            in_specs=[
                pl.BlockSpec((1, (Ho + 3) * Wp, Ep), lambda bi: (bi, 0, 0)),
                pl.BlockSpec((9, Ep, Ep), lambda bi: (0, 0, 0)),   # weights (resident)
                pl.BlockSpec((1, Ep), lambda bi: (0, 0)),          # folded bias
            ],
            out_specs=pl.BlockSpec((1, Lout, Ep), lambda bi: (bi, 0, 0)),
        ),
        compiler_params=pltpu.CompilerParams(dimension_semantics=("parallel",)),
        cost_estimate=cost,
    )(xflat, w_taps, b.reshape(1, Ep))
    # Drop the 2 junk columns per output row introduced by the flattened-stride trick.
    return out.reshape(B, Ho, Wp, Ep)[:, :, :Wo, :]


# ------------------------------ JAX glue ------------------------------------ #
def extract_patches(x_nhwc, kh, kw, sh, sw, ph, pw):
    """im2col: (B,H,W,C) -> (B, Ho, Wo, kh*kw*C), flatten order (kh, kw, C)."""
    B, H, W, C = x_nhwc.shape
    x = jnp.pad(x_nhwc, ((0, 0), (ph, ph), (pw, pw), (0, 0)))
    Ho = (H + 2 * ph - kh) // sh + 1
    Wo = (W + 2 * pw - kw) // sw + 1
    i_idx = (jnp.arange(Ho) * sh)[:, None] + jnp.arange(kh)[None, :]   # (Ho, kh)
    j_idx = (jnp.arange(Wo) * sw)[:, None] + jnp.arange(kw)[None, :]   # (Wo, kw)
    patches = x[:, i_idx[:, None, :, None], j_idx[None, :, None, :], :]
    return patches.reshape(B, Ho, Wo, kh * kw * C), Ho, Wo


def _pt_weight_to_mat(w_oihw):
    """PyTorch (O, I, kh, kw) -> (kh*kw*I, O) matching (kh, kw, C) patch order."""
    O, I, kh, kw = w_oihw.shape
    return jnp.transpose(w_oihw, (2, 3, 1, 0)).reshape(kh * kw * I, O)


def init_params(key, input_channels, embed_dim, patch_size, num_conv_layers):
    kh, kw = patch_size
    keys = jax.random.split(key, 2 + 6 * num_conv_layers)
    k = iter(keys)
    params = {
        "conv_w": 0.1 * jax.random.normal(next(k), (embed_dim, input_channels, kh, kw), jnp.float32),
        "conv_b": 0.1 * jax.random.normal(next(k), (embed_dim,), jnp.float32),
        "additional": [],
    }
    for _ in range(num_conv_layers):
        params["additional"].append({
            "w": 0.1 * jax.random.normal(next(k), (embed_dim, embed_dim, 3, 3), jnp.float32),
            "b": 0.1 * jax.random.normal(next(k), (embed_dim,), jnp.float32),
            "gamma": 1.0 + 0.1 * jax.random.normal(next(k), (embed_dim,), jnp.float32),
            "beta": 0.1 * jax.random.normal(next(k), (embed_dim,), jnp.float32),
            "running_mean": 0.1 * jax.random.normal(next(k), (embed_dim,), jnp.float32),
            "running_var": jax.random.uniform(next(k), (embed_dim,), jnp.float32, 0.5, 1.5),
        })
    return params


def tokenized_backbone_forward(params, x_nchw, *, patch_size, stride, padding,
                               eps=1e-5, tm=256):
    B, C, H, W = x_nchw.shape
    E = params["conv_w"].shape[0]
    Ep = _round_up(E, 128)          # lane-dense channel dim carried through all layers
    kh, kw = patch_size
    sh, sw = stride
    ph, pw = padding

    x = jnp.transpose(x_nchw, (0, 2, 3, 1))  # NHWC

    # --- Patch-embedding conv (im2col matmul; no BN / no ReLU). ---
    patches, Ho, Wo = extract_patches(x, kh, kw, sh, sw, ph, pw)
    K = kh * kw * C
    Kp = _round_up(K, 128)
    pm = patches.reshape(B * Ho * Wo, K)
    if Kp != K:
        pm = jnp.pad(pm, ((0, 0), (0, Kp - K)))
    w1 = jnp.pad(_pt_weight_to_mat(params["conv_w"]), ((0, Kp - K), (0, Ep - E)))
    b1 = jnp.pad(params["conv_b"], (0, Ep - E))
    y = matmul_bias(pm, w1, b1, tm=tm).reshape(B, Ho, Wo, Ep)

    # --- additional_convs: [Conv3x3 + BN + ReLU] x num_conv_layers (BN folded). ---
    for layer in params["additional"]:
        inv_std = 1.0 / jnp.sqrt(layer["running_var"] + eps)
        scale = layer["gamma"] * inv_std
        shift = layer["beta"] - layer["running_mean"] * scale
        # (O, I, 3, 3) -> taps (9, I, O) with BN scale folded into the output channel.
        w_taps = jnp.transpose(layer["w"], (2, 3, 1, 0)).reshape(9, E, E) * scale[None, None, :]
        w_taps = jnp.pad(w_taps, ((0, 0), (0, Ep - E), (0, Ep - E)))
        b_f = jnp.pad(layer["b"] * scale + shift, (0, Ep - E))
        y = conv3x3_bias_relu(y, w_taps, b_f)

    # Back to NCHW, dropping the lane-padding channels: (B, E, Ho, Wo).
    return jnp.transpose(y[..., :E], (0, 3, 1, 2))


# ------------------------- pure-JAX reference ------------------------------- #
def reference_forward(params, x_nchw, *, patch_size, stride, padding, eps=1e-5):
    dn = ("NCHW", "OIHW", "NCHW")
    y = jax.lax.conv_general_dilated(
        x_nchw, params["conv_w"], window_strides=stride,
        padding=[(padding[0], padding[0]), (padding[1], padding[1])],
        dimension_numbers=dn)
    y = y + params["conv_b"][None, :, None, None]
    for layer in params["additional"]:
        y = jax.lax.conv_general_dilated(
            y, layer["w"], window_strides=(1, 1),
            padding=[(1, 1), (1, 1)], dimension_numbers=dn)
        y = y + layer["b"][None, :, None, None]
        inv_std = 1.0 / jnp.sqrt(layer["running_var"] + eps)
        y = (y - layer["running_mean"][None, :, None, None]) * inv_std[None, :, None, None]
        y = y * layer["gamma"][None, :, None, None] + layer["beta"][None, :, None, None]
        y = jnp.maximum(y, 0.0)
    return y


# --------------------------------- main -------------------------------------- #
if __name__ == "__main__":
    # Small shapes consistent with the module (scaled-down defaults).
    B, C, H, W = 2, 1, 16, 16
    embed_dim = 32
    patch_size = (8, 8)
    stride = (4, 4)
    padding = (0, 0)
    num_conv_layers = 2

    key = jax.random.PRNGKey(0)
    kx, kp = jax.random.split(key)
    x = jax.random.normal(kx, (B, C, H, W), jnp.float32)
    params = init_params(kp, C, embed_dim, patch_size, num_conv_layers)

    out = tokenized_backbone_forward(params, x, patch_size=patch_size,
                                     stride=stride, padding=padding)
    out = jax.block_until_ready(out)

    ref = reference_forward(params, x, patch_size=patch_size,
                            stride=stride, padding=padding)
    assert out.shape == ref.shape == (B, embed_dim, 3, 3), out.shape
    assert jnp.allclose(out, ref, atol=1e-3, rtol=1e-3), "mismatch vs reference"

    print("KERNEL_OK")
</pallas_src>

<mosaic_0001>
module attributes {stable_mosaic.version = 11 : i64} {
  func.func @_matmul_bias_kernel(%arg0: i32, %arg1: memref<24x128xf32, #tpu.memory_space<vmem>>, %arg2: memref<128x128xf32, #tpu.memory_space<vmem>>, %arg3: memref<1x128xf32, #tpu.memory_space<vmem>>, %arg4: memref<24x128xf32, #tpu.memory_space<vmem>>) attributes {dimension_semantics = [#tpu.dimension_semantics<parallel>], iteration_bounds = array<i64: 1>, scalar_prefetch = 0 : i64, scratch_operands = 0 : i64, tpu.core_type = #tpu.core_type<tc>, window_params = [{transform_indices = @transform_0, window_bounds = array<i64: 24, 128>}, {pipeline_mode = #tpu.pipeline_mode<synchronous>, transform_indices = @transform_1, window_bounds = array<i64: 128, 128>}, {pipeline_mode = #tpu.pipeline_mode<synchronous>, transform_indices = @transform_2, window_bounds = array<i64: 1, 128>}, {transform_indices = @transform_3, window_bounds = array<i64: 24, 128>}]} {
    %c0 = arith.constant 0 : index
    %c0_0 = arith.constant 0 : index
    %0 = vector.load %arg1[%c0, %c0_0] : memref<24x128xf32, #tpu.memory_space<vmem>>, vector<24x128xf32>
    %c0_1 = arith.constant 0 : index
    %c0_2 = arith.constant 0 : index
    %1 = vector.load %arg2[%c0_1, %c0_2] : memref<128x128xf32, #tpu.memory_space<vmem>>, vector<128x128xf32>
    %cst = arith.constant dense<0.000000e+00> : vector<24x128xf32>
    %2 = tpu.matmul %0, %1, %cst {dimension_numbers = #tpu.dot_dimension_numbers<[1], [0], [0], [1], [0, 0, 1, 1], [], []>} : vector<24x128xf32>, vector<128x128xf32>, vector<24x128xf32> -> vector<24x128xf32>
    %c0_3 = arith.constant 0 : index
    %c0_4 = arith.constant 0 : index
    %3 = vector.load %arg3[%c0_3, %c0_4] : memref<1x128xf32, #tpu.memory_space<vmem>>, vector<1x128xf32>
    %4 = vector.broadcast %3 : vector<1x128xf32> to vector<24x128xf32>
    %5 = arith.addf %2, %4 : vector<24x128xf32>
    %c0_5 = arith.constant 0 : index
    %c0_6 = arith.constant 0 : index
    %6 = vector.load %arg4[%c0_5, %c0_6] : memref<24x128xf32, #tpu.memory_space<vmem>>, vector<24x128xf32>
    tpu.vector_store %arg4[%c0_5, %c0_6], %5 {strides = array<i32>} : memref<24x128xf32, #tpu.memory_space<vmem>>, vector<24x128xf32>,
    return
  }
  func.func @transform_0(%arg0: i32) -> (i32, i32) {
    %c0_i32 = arith.constant 0 : i32
    %c0_i32_0 = arith.constant 0 : i32
    return %arg0, %c0_i32 : i32, i32
  }
  func.func @transform_1(%arg0: i32) -> (i32, i32) {
    %c0_i32 = arith.constant 0 : i32
    %c0_i32_0 = arith.constant 0 : i32
    %c0_i32_1 = arith.constant 0 : i32
    return %c0_i32, %c0_i32_0 : i32, i32
  }
  func.func @transform_2(%arg0: i32) -> (i32, i32) {
    %c0_i32 = arith.constant 0 : i32
    %c0_i32_0 = arith.constant 0 : i32
    %c0_i32_1 = arith.constant 0 : i32
    return %c0_i32, %c0_i32_0 : i32, i32
  }
  func.func @transform_3(%arg0: i32) -> (i32, i32) {
    %c0_i32 = arith.constant 0 : i32
    %c0_i32_0 = arith.constant 0 : i32
    return %arg0, %c0_i32 : i32, i32
  }
}

</mosaic_0001>

<bundles_post_ra>
// kernel: tpu_custom_call.1
= control target key start
LH: loop header
LB: loop body
LE: loop exit
PB: predicated region body
PF: predicated region fallthrough
CT: control target
= control target key end

     0   :  { %8 = vsyncpa [#allocation3], 0  ;;  %s422_s0 = inlined_call_operand.hbm [shape: f32[24,128], index: 0, kind: input, shape index: {}]   ;;  %s423_s1 = inlined_call_operand.hbm [shape: f32[128,128], index: 1, kind: input, shape index: {}]   ;;  %s424_s2 = inlined_call_operand.vmem [shape: f32[1,128], index: 2, kind: input, shape index: {}]   ;;  %s425_s3 = inlined_call_operand.hbm [shape: f32[24,128], index: 3, kind: output, shape index: {}]  }
   0x1   :  { %9 = vsyncpa [#allocation6], 0 }
   0x2   :  { %10 = vsyncpa [#allocation4], 0  ;;  %s336_s12 = smov [#allocation2]  }
   0x3   :  { %s16_s13 = sshll.u32 %s336_s12, 4  ;;  %s17_s13 = int_to_ptr.vmem [resolvable:$true] %s16_s13 }
   0x4   :  { %s278_s14 = scalar_lea.vmem %s17_s13, 384  ;;  %p283_p1 = scmp.lt.s32.totalorder %s17_s13, %s17_s13 }
   0x5   :  { %p279_p0 = scmp.ne.s32.totalorder %s17_s13, %s278_s14  ;;  %p284_p2 = scmp.lt.s32.totalorder %s278_s14, %s278_s14 }
   0x7   :  { %p285_p3 = por %p284_p2, %p283_p1 }
   0x9   :  { %p286_p4 = pnand %p285_p3, %p279_p0 }
   0xb   :  { %289 = shalt.err (!%p286_p4)
}
   0xc   :  { %s337_s15 = smov 128   ;;  %s338_s16 = smov 8  }
   0xd   :  { %22 = dma.hbm_to_vmem [thread:$0]  %s422_s0, 384, %s17_s13, [#allocation3], %s337_s15, %s337_s15, %s338_s16  }
   0xe   :  { %s339_s19 = smov [#allocation5]  }
   0xf   :  { %s28_s20 = sshll.u32 %s339_s19, 4  ;;  %s29_s20 = int_to_ptr.vmem [resolvable:$true] %s28_s20 }
  0x10   :  { %s298_s21 = scalar_lea.vmem %s29_s20, 2048  ;;  %p303_p6 = scmp.lt.s32.totalorder %s29_s20, %s29_s20 }
  0x11   :  { %p299_p5 = scmp.ne.s32.totalorder %s29_s20, %s298_s21  ;;  %p304_p7 = scmp.lt.s32.totalorder %s298_s21, %s298_s21 }
  0x13   :  { %p305_p8 = por %p304_p7, %p303_p6 }
  0x15   :  { %p306_p9 = pnand %p305_p8, %p299_p5 }
  0x17   :  { %309 = shalt.err (!%p306_p9)
}
  0x18   :  { %34 = dma.hbm_to_vmem [thread:$0]  %s423_s1, 2048, %s29_s20, [#allocation6], %s337_s15, %s337_s15, %s338_s16  }
  0x19   :  { %330 = dma.done.wait [#allocation3], 384  }
  0x1a   :  { %331 = vsyncadd [#allocation3], 4294966912 }
  0x1b   :  { %332 = dma.done.wait [#allocation6], 2048  }
  0x1c   :  { %333 = vsyncadd [#allocation6], 4294965248  ;;  %v340_v0 = vmov 0.0   ;;  %vm341_vm0 = vmmov 0   ;;  %v61_v1 = vld [vmem:[#allocation5 + $0x78] sm:$0xff]  ;;  %v60_v2 = vld [vmem:[#allocation5 + $0x70] sm:$0xff] }
  0x1d   :  { %231 = vmatprep.subr.mxu1 %v340_v0  ;;  %190 = vmatprep.subr.mxu0 %v340_v0  ;;  %v59_v3 = vld [vmem:[#allocation5 + $0x68] sm:$0xff]  ;;  %v58_v4 = vld [vmem:[#allocation5 + $0x60] sm:$0xff]  ;;  %v57_v5 = vld [vmem:[#allocation5 + $0x58] sm:$0xff]  ;;  %s342_s24 = smov [#allocation7]  }
  0x1e   :  { %225 = vmatprep.mubr.msk.f32.mxu1 %vm341_vm0, %v340_v0  ;;  %222 = vmatprep.mubr.msk.f32.mxu0 %vm341_vm0, %v340_v0  ;;  %v56_v6 = vld [vmem:[#allocation5 + $0x50] sm:$0xff]  ;;  %v55_v7 = vld [vmem:[#allocation5 + $0x48] sm:$0xff]  ;;  %v54_v8 = vld [vmem:[#allocation5 + $0x40] sm:$0xff]  ;;  %s157_s25 = sshll.u32 %s342_s24, 4  ;;  %s158_s25 = int_to_ptr.vmem [resolvable:$true] %s157_s25 }
  0x1f   :  { %247 = vmatpush3.msra.mxu1 %v61_v1  ;;  %191 = vmatpush3.msra.mxu0 %v61_v1  ;;  %v53_v9 = vld [vmem:[#allocation5 + $0x38] sm:$0xff]  ;;  %v52_v10 = vld [vmem:[#allocation5 + $0x30] sm:$0xff]  ;;  %v51_v11 = vld [vmem:[#allocation5 + $0x28] sm:$0xff]  ;;  %s310_s26 = scalar_lea.vmem %s158_s25, 384  ;;  %p315_p11 = scmp.lt.s32.totalorder %s158_s25, %s158_s25 }
  0x20   :  { %232 = vmatprep.subr.mxu1 %v340_v0  ;;  %192 = vmatprep.subr.mxu0 %v340_v0  ;;  %v50_v12 = vld [vmem:[#allocation5 + $0x20] sm:$0xff]  ;;  %v49_v13 = vld [vmem:[#allocation5 + $0x18] sm:$0xff]  ;;  %v48_v14 = vld [vmem:[#allocation5 + $0x10] sm:$0xff]  ;;  %p311_p10 = scmp.ne.s32.totalorder %s158_s25, %s310_s26  ;;  %p316_p12 = scmp.lt.s32.totalorder %s310_s26, %s310_s26 }
  0x21   :  { %248 = vmatpush3.msra.mxu1 %v60_v2  ;;  %193 = vmatpush3.msra.mxu0 %v60_v2  ;;  %v47_v15 = vld [vmem:[#allocation5 + $0x8] sm:$0xff]  ;;  %v46_v16 = vld [vmem:[#allocation5] sm:$0xff]  ;;  %v44_v17 = vld [vmem:[#allocation2 + $0x8] sm:$0xff] }
  0x22   :  { %233 = vmatprep.subr.mxu1 %v340_v0  ;;  %194 = vmatprep.subr.mxu0 %v340_v0  ;;  %v43_v18 = vld [vmem:[#allocation2] sm:$0xff]  ;;  %v45_v19 = vld [vmem:[#allocation2 + $0x10] sm:$0xff]  ;;  %p317_p13 = por %p316_p12, %p315_p11 }
  0x23   :  { %249 = vmatpush3.msra.mxu1 %v59_v3  ;;  %195 = vmatpush3.msra.mxu0 %v59_v3  ;;  %v170_v20 = vld [vmem:[%s424_s2] ss:$0 sm:$0xff] }
  0x24   :  { %234 = vmatprep.subr.mxu1 %v340_v0  ;;  %196 = vmatprep.subr.mxu0 %v340_v0  ;;  %p318_p0 = pnand %p317_p13, %p311_p10 }
  0x25   :  { %250 = vmatpush3.msra.mxu1 %v58_v4  ;;  %197 = vmatpush3.msra.mxu0 %v58_v4 }
  0x26   :  { %235 = vmatprep.subr.mxu1 %v340_v0  ;;  %198 = vmatprep.subr.mxu0 %v340_v0 }
  0x27   :  { %251 = vmatpush3.msra.mxu1 %v57_v5  ;;  %199 = vmatpush3.msra.mxu0 %v57_v5 }
  0x28   :  { %236 = vmatprep.subr.mxu1 %v340_v0  ;;  %200 = vmatprep.subr.mxu0 %v340_v0 }
  0x29   :  { %252 = vmatpush3.msra.mxu1 %v56_v6  ;;  %201 = vmatpush3.msra.mxu0 %v56_v6 }
  0x2a   :  { %237 = vmatprep.subr.mxu1 %v340_v0  ;;  %202 = vmatprep.subr.mxu0 %v340_v0 }
  0x2b   :  { %253 = vmatpush3.msra.mxu1 %v55_v7  ;;  %203 = vmatpush3.msra.mxu0 %v55_v7 }
  0x2c   :  { %238 = vmatprep.subr.mxu1 %v340_v0  ;;  %204 = vmatprep.subr.mxu0 %v340_v0 }
  0x2d   :  { %254 = vmatpush3.msra.mxu1 %v54_v8  ;;  %205 = vmatpush3.msra.mxu0 %v54_v8 }
  0x2e   :  { %239 = vmatprep.subr.mxu1 %v340_v0  ;;  %206 = vmatprep.subr.mxu0 %v340_v0 }
  0x2f   :  { %255 = vmatpush3.msra.mxu1 %v53_v9  ;;  %207 = vmatpush3.msra.mxu0 %v53_v9 }
  0x30   :  { %240 = vmatprep.subr.mxu1 %v340_v0  ;;  %208 = vmatprep.subr.mxu0 %v340_v0 }
  0x31   :  { %256 = vmatpush3.msra.mxu1 %v52_v10  ;;  %209 = vmatpush3.msra.mxu0 %v52_v10 }
  0x32   :  { %241 = vmatprep.subr.mxu1 %v340_v0  ;;  %210 = vmatprep.subr.mxu0 %v340_v0 }
  0x33   :  { %257 = vmatpush3.msra.mxu1 %v51_v11  ;;  %211 = vmatpush3.msra.mxu0 %v51_v11 }
  0x34   :  { %242 = vmatprep.subr.mxu1 %v340_v0  ;;  %212 = vmatprep.subr.mxu0 %v340_v0 }
  0x35   :  { %258 = vmatpush3.msra.mxu1 %v50_v12  ;;  %213 = vmatpush3.msra.mxu0 %v50_v12 }
  0x36   :  { %243 = vmatprep.subr.mxu1 %v340_v0  ;;  %214 = vmatprep.subr.mxu0 %v340_v0 }
  0x37   :  { %259 = vmatpush3.msra.mxu1 %v49_v13  ;;  %215 = vmatpush3.msra.mxu0 %v49_v13 }
  0x38   :  { %244 = vmatprep.subr.mxu1 %v340_v0  ;;  %216 = vmatprep.subr.mxu0 %v340_v0 }
  0x39   :  { %260 = vmatpush3.msra.mxu1 %v48_v14  ;;  %217 = vmatpush3.msra.mxu0 %v48_v14 }
  0x3a   :  { %245 = vmatprep.subr.mxu1 %v340_v0  ;;  %218 = vmatprep.subr.mxu0 %v340_v0 }
  0x3b   :  { %261 = vmatpush3.msra.mxu1 %v47_v15  ;;  %219 = vmatpush3.msra.mxu0 %v47_v15 }
  0x3c   :  { %246 = vmatprep.subr.mxu1 %v340_v0  ;;  %220 = vmatprep.subr.mxu0 %v340_v0 }
  0x3d   :  { %262 = vmatpush3.msra.mxu1 %v46_v16  ;;  %221 = vmatpush3.msra.mxu0 %v46_v16 }
  0x3e   :  { %226 = vmatmul.mubr.f32.vlgmr.msra.gmra.mxu1 %v44_v17  ;;  %223 = vmatmul.mubr.f32.vlgmr.msra.gmra.mxu0 %v43_v18 }
  0x3f   :  { %228 = vmatprep.mubr.msk.f32.mxu1 %vm341_vm0, %v340_v0 }
  0x42   :  { %229 = vmatmul.mubr.f32.gmra.mxu1 %v45_v19 }
  0xfe   :  { %v140_v21 = vpop.f32.mrf.mxu1  ;;  %v135_v22 = vpop.f32.mrf.mxu0 }
  0xff   :  { %v141_v23 = vadd.f32 %v170_v20, %v140_v21  ;;  %v136_v24 = vadd.f32 %v170_v20, %v135_v22 }
 0x100   :  { %v227_v25 = vpop.f32.mrf.mxu1  ;;  %v224_v26 = vpop.f32.mrf.mxu0 }
 0x101   :  { %150 = vst [vmem:[#allocation7 + $0x8] sm:$0xff] %v141_v23  ;;  %149 = vst [vmem:[#allocation7] sm:$0xff] %v136_v24 }
 0x102   :  { %v145_v27 = vpop.f32.mrf.mxu1 }
 0x103   :  { %v146_v28 = vadd.f32 %v170_v20, %v145_v27 }
 0x104   :  { %v230_v29 = vpop.f32.mrf.mxu1 }
 0x105   :  { %151 = vst [vmem:[#allocation7 + $0x10] sm:$0xff] %v146_v28 }
 0x106   :  { %321 = shalt.err (!%p318_p0)
}
 0x107   :  { %163 = dma.vmem_to_hbm [thread:$0]  %s158_s25, 384, %s425_s3, [#allocation4], %s337_s15, %s337_s15, %s338_s16  }
 0x108   :  { %334 = dma.done.wait [#allocation4], 384  }
 0x109   :  { %335 = vsyncadd [#allocation4], 4294966912 }
 0x10a   :  { %167 = vsyncpa [#allocation3], 1 }
 0x10b   :  { %168 = vsyncpa [#allocation6], 1 }
 0x10c   :  { %169 = vsyncpa [#allocation4], 1 }

</bundles_post_ra>
